<compile_context>
chip_gen: v5e
topology: v5e:2x2
jax: 0.10.0
libtpu: 0.0.40
codegen_flags: <defaults>
</compile_context>

<pallas_src>
import functools

import jax
import jax.numpy as jnp
import numpy as np
from jax.experimental import pallas as pl
from jax.experimental.pallas import tpu as pltpu

EPS = 1e-5


# --------------------------------------------------------------------------------------
# Stage 1: conv1x1_1 -> BN1(train) -> ReLU -> conv1x1_2   (gridded over the conv1 channel
# axis, which is also the spatial axis of the conv1x1_2 output)
# --------------------------------------------------------------------------------------
def intrafusion_stage1_kernel(xt_ref,    # (B, S, C)   channels-last input slab (resident)
                              w1t_ref,   # (C, TILE)   conv1x1_1 weight^T, tiled
                              g1_ref,    # (1, TILE)   BN1 gamma tile
                              b1_ref,    # (1, TILE)   BN1 beta tile
                              w2_ref,    # (C, S)      conv1x1_2 weight (resident)
                              o_ref,     # (B, C, TILE) pre-BN2 output tile (channels-first)
                              *, conv_dtype):
    B, S, _ = xt_ref.shape
    n = B * S

    # Weight-stationary operands (no (B, ...) broadcast of weights).
    w1t = w1t_ref[...].astype(conv_dtype)                     # (C, TILE)
    w2 = w2_ref[...].astype(conv_dtype)                       # (Cout, S)

    # conv1x1_1 as B plain 2-D MXU matmuls: f[b][q, p] = sum_c X[b, c, q] * w1[p, c]
    # (q = original spatial, p = conv1 channel == unfolded spatial).  f is channels-last
    # in-tile, which is exactly the layout conv1x1_2 wants -- no big transpose anywhere.
    f_pre = [jnp.dot(xt_ref[b].astype(conv_dtype), w1t,
                     preferred_element_type=jnp.float32) for b in range(B)]  # (S, TILE) f32

    # BN1 (training mode, biased batch stats per conv1 channel): two-pass, batch first.
    acc = f_pre[0]
    for b in range(1, B):
        acc = acc + f_pre[b]
    mean1 = jnp.sum(acc, axis=0, keepdims=True) * (1.0 / n)   # (1, TILE)
    sq = None
    for b in range(B):
        d = f_pre[b] - mean1
        sq = d * d if sq is None else sq + d * d
    var1 = jnp.sum(sq, axis=0, keepdims=True) * (1.0 / n)
    scale1 = g1_ref[...] * jax.lax.rsqrt(var1 + EPS)          # folded scale/shift FMA
    shift1 = b1_ref[...] - mean1 * scale1

    # BN1 + ReLU, then conv1x1_2.  The "unfolding" channel<->spatial transpose is
    # absorbed by contracting f's original-spatial axis q against w2 directly:
    #   o[b, c, p] = sum_q w2[c, q] * f[b][q, p]
    for b in range(B):
        fb = jnp.maximum(f_pre[b] * scale1 + shift1, 0.0)     # (S, TILE)
        o_ref[b] = jnp.dot(w2, fb.astype(conv_dtype),
                           preferred_element_type=jnp.float32).astype(o_ref.dtype)


# --------------------------------------------------------------------------------------
# Stage 2: BN2 -> ReLU -> ChannelAttention (gate folded into w3) -> conv1x1 -> BN3 ->
# ReLU -> out  +  Gram -> softmax(dim=1) -> softmax(dim=2).  All tensors here are small
# (B*C*S, B*K*S), so a single grid step with whole-batch BN statistics is fine.
# --------------------------------------------------------------------------------------
def intrafusion_stage2_kernel(o_ref,                         # (B, C, S) pre-BN2, channels-first
                              g2_ref, b2_ref,                 # (1, C, 1)
                              waT_ref, ba_ref,                # (C, C), (1, C)  fc_AvgPool
                              wsT_ref, bs_ref,                # (C, C), (1, C)  fc_siPool
                              w3_ref, g3_ref, b3_ref,         # (K, C), (1, K, 1), (1, K, 1)
                              out_ref,                        # (B, K, S)
                              c_ref):                         # (B, K, K)
    B, C, S = o_ref.shape
    n = B * S
    o_pre = o_ref[...]                                        # (B, C, S) f32

    # ---- BN2 (training mode, biased): two-pass, batch-axis reduced first (VPU adds) ----
    sb = jnp.sum(o_pre, axis=0, keepdims=True)                # (1, C, S)
    mean2 = jnp.sum(sb, axis=2, keepdims=True) * (1.0 / n)    # (1, C, 1)
    d2 = o_pre - mean2
    var2 = jnp.sum(jnp.sum(d2 * d2, axis=0, keepdims=True),
                   axis=2, keepdims=True) * (1.0 / n)
    scale2 = g2_ref[...] * jax.lax.rsqrt(var2 + EPS)
    shift2 = b2_ref[...] - mean2 * scale2
    o = jnp.maximum(o_pre * scale2 + shift2, 0.0)             # (B, C, S)

    # ---- ChannelAttention: avg pooling + unbiased std pooling + two FCs + gate ----
    avg = jnp.sum(o, axis=2) * (1.0 / S)                      # (B, C)  AdaptiveAvgPool2d(1)
    dc = o - avg[:, :, None]
    si = jnp.sqrt(jnp.sum(dc * dc, axis=2) * (1.0 / (S - 1))) # (B, C)  std(dim=2, unbiased)
    aw = jnp.maximum(jnp.dot(avg, waT_ref[...],
                             preferred_element_type=jnp.float32) + ba_ref[...], 0.0)
    sw = jnp.maximum(jnp.dot(si, wsT_ref[...],
                             preferred_element_type=jnp.float32) + bs_ref[...], 0.0)
    # TODO(synk): PyTorch source calls undefined `self.soft`; the module only defines
    # sigmoid, so the sigmoid gate is used (documented semantic substitution).
    wgt = 1.0 / (1.0 + jnp.exp(-(aw + sw)))                   # (B, C)

    # ---- conv1x1 with the attention gate folded into the (tiny) weight ----
    # y[b,k,s] = sum_c (w3[k,c] * wgt[b,c]) * o[b,c,s]  -- no (B,C,S) scaling pass.
    w3g = w3_ref[...][None, :, :] * wgt[:, None, :]           # (B, K, C)
    y_pre = jnp.einsum('bkc,bcs->bks', w3g, o,
                       preferred_element_type=jnp.float32)    # (B, K, S)

    # ---- BN3 (training mode, biased) + ReLU: two-pass, folded scale/shift ----
    sb3 = jnp.sum(y_pre, axis=0, keepdims=True)
    mean3 = jnp.sum(sb3, axis=2, keepdims=True) * (1.0 / n)
    d3 = y_pre - mean3
    var3 = jnp.sum(jnp.sum(d3 * d3, axis=0, keepdims=True),
                   axis=2, keepdims=True) * (1.0 / n)
    scale3 = g3_ref[...] * jax.lax.rsqrt(var3 + EPS)
    shift3 = b3_ref[...] - mean3 * scale3
    y = jnp.maximum(y_pre * scale3 + shift3, 0.0)             # (B, K, S)
    out_ref[...] = y.astype(out_ref.dtype)                    # lane-dense store along S

    # ---- Gram + softmax(dim=1) then softmax(dim=2); kept in f32 (rounding-sensitive) ----
    g = jnp.einsum('bis,bjs->bij', y, y, preferred_element_type=jnp.float32)   # (B, K, K)
    e1 = jnp.exp(g - jnp.max(g, axis=1, keepdims=True))
    c1 = e1 / jnp.sum(e1, axis=1, keepdims=True)
    e2 = jnp.exp(c1 - jnp.max(c1, axis=2, keepdims=True))
    c_ref[...] = (e2 / jnp.sum(e2, axis=2, keepdims=True)).astype(c_ref.dtype)


# --------------------------------------------------------------------------------------
# Wrapper
# --------------------------------------------------------------------------------------
def _vmem_capacity_bytes():
    """Per-core VMEM capacity; conservative fallback if the query is unavailable."""
    try:
        info = pltpu.get_tpu_info()
        cap = int(getattr(info, "vmem_capacity_bytes", 0))
        if cap > 0:
            return cap
    except Exception:
        pass
    return 64 * 1024 * 1024  # v7x per-TensorCore size: a safe lower bound everywhere


def _choose_f2_tile(F2, B, S):
    """Tile of the conv1-channel axis (== conv1x1_2 output spatial axis).

    Must divide F2 and be a multiple of 128 (lane/block constraint) unless it covers F2
    entirely.  Sized so the live f-tile copies stay ~8 MiB; >= 2 grid steps when possible
    so v7x can split them across its TensorCores.
    """
    if F2 % 128 != 0 or F2 == 128:
        return F2
    budget = 8 * 1024 * 1024
    max_tile = max(128, (budget // (4 * (B + 3) * S)) // 128 * 128)
    best = 128
    t = 128
    while t <= F2 // 2:
        if F2 % t == 0 and t <= max_tile:
            best = t
        t += 128
    return best


def intrafusion_spectral(x11, x22, params, conv_dtype=None):
    """NCHW in -> (out (B, ch_out, H, W), c_normalized (B, ch_out, ch_out))."""
    B, C1, H, W = x11.shape
    C2 = x22.shape[1]
    C = C1 + C2
    S = H * W
    F2 = params['w1'].shape[0]
    K = params['w3'].shape[0]
    assert S == F2, "unfolding requires H*W == featuresize**2"
    assert params['w2'].shape == (C, F2)

    if conv_dtype is None:
        # bf16 MXU operands pay off once the conv1x1_2 contraction (length S) is large
        # enough to be MXU-bound; at toy contraction sizes the kernel is VPU/overhead
        # bound and f32 keeps exact parity with the PyTorch reference.
        conv_dtype = jnp.bfloat16 if S >= 256 else jnp.float32

    f32 = jnp.float32
    # Channels-last input slab (B, S, C): torch.cat becomes a trivial XLA concat of the
    # small raw inputs (negligible next to the F2 x S intermediates it saves in-kernel).
    x_t = jnp.concatenate(
        [x11.reshape(B, C1, S), x22.reshape(B, C2, S)], axis=1
    ).astype(f32).transpose(0, 2, 1)                               # (B, S, C)
    w1t = params['w1'].astype(f32).T                               # (C, F2)
    g1 = params['g1'].astype(f32).reshape(1, F2)
    b1 = params['b1'].astype(f32).reshape(1, F2)
    w2 = params['w2'].astype(f32)                                  # (C, F2); contracted dim == S

    tile = _choose_f2_tile(F2, B, S)
    num_tiles = F2 // tile

    cap = _vmem_capacity_bytes()
    # True stage-1 working set: resident x_t and w2, (B+3) live copies of the (S, tile)
    # f-tile, double-buffered small streamed blocks and the output tile.
    work_a = 4 * (B * S * C + 2 * (C + 2) * tile + C * S
                  + (B + 3) * S * tile + 2 * B * C * tile) + (2 << 20)
    vmem_a = int(min(0.75 * cap, max(2 * work_a, 8 << 20)))

    o_pre = pl.pallas_call(
        functools.partial(intrafusion_stage1_kernel, conv_dtype=conv_dtype),
        grid=(num_tiles,),
        in_specs=[
            pl.BlockSpec((B, S, C), lambda i: (0, 0, 0)),          # x_t (resident)
            pl.BlockSpec((C, tile), lambda i: (0, i)),             # w1^T tile
            pl.BlockSpec((1, tile), lambda i: (0, i)),             # gamma1 tile
            pl.BlockSpec((1, tile), lambda i: (0, i)),             # beta1 tile
            pl.BlockSpec((C, S), lambda i: (0, 0)),                # w2 (resident)
        ],
        out_specs=pl.BlockSpec((B, C, tile), lambda i: (0, 0, i)),
        out_shape=jax.ShapeDtypeStruct((B, C, F2), f32),
        compiler_params=pltpu.CompilerParams(
            dimension_semantics=("parallel",),   # tiles independent -> both v7x TCs
            vmem_limit_bytes=vmem_a),
    )(x_t, w1t, g1, b1, w2)

    args_b = (
        o_pre,
        params['g2'].astype(f32).reshape(1, C, 1), params['b2'].astype(f32).reshape(1, C, 1),
        params['wa'].astype(f32).T, params['ba'].astype(f32).reshape(1, C),
        params['ws'].astype(f32).T, params['bs'].astype(f32).reshape(1, C),
        params['w3'].astype(f32),
        params['g3'].astype(f32).reshape(1, K, 1), params['b3'].astype(f32).reshape(1, K, 1),
    )
    work_b = 4 * (5 * B * C * S + 4 * B * K * S + 2 * C * C
                  + 2 * B * K * C + 4 * B * K * K) + (2 << 20)
    vmem_b = int(min(0.75 * cap, max(2 * work_b, 8 << 20)))

    def full_spec(a):
        nd = a.ndim
        return pl.BlockSpec(a.shape, lambda i, _nd=nd: (0,) * _nd)

    out_flat, c_norm = pl.pallas_call(
        intrafusion_stage2_kernel,
        grid=(1,),
        in_specs=[full_spec(a) for a in args_b],
        out_specs=(pl.BlockSpec((B, K, S), lambda i: (0, 0, 0)),
                   pl.BlockSpec((B, K, K), lambda i: (0, 0, 0))),
        out_shape=(jax.ShapeDtypeStruct((B, K, S), f32),
                   jax.ShapeDtypeStruct((B, K, K), f32)),
        compiler_params=pltpu.CompilerParams(
            dimension_semantics=("arbitrary",),
            vmem_limit_bytes=vmem_b),
    )(*args_b)

    out = out_flat.reshape(B, K, H, W)     # pure reshape (already channels-first)
    return out, c_norm


# --------------------- pure-JAX reference (NCHW, mirrors PyTorch) ---------------------
def reference(x11, x22, params, conv_dtype=jnp.float32):
    """conv_dtype emulates the kernel's per-stage MXU operand dtype for conv1/conv2."""
    X = jnp.concatenate([x11, x22], axis=1)
    B, C, H, W = X.shape
    S = H * W
    is_f32 = np.dtype(conv_dtype) == np.dtype(np.float32)

    def bn_relu(y, g, b):
        mean = jnp.mean(y, axis=(0, 2, 3), keepdims=True)
        var = jnp.mean((y - mean) ** 2, axis=(0, 2, 3), keepdims=True)
        yn = (y - mean) * jax.lax.rsqrt(var + EPS)
        return jnp.maximum(yn * g[None, :, None, None] + b[None, :, None, None], 0.0)

    def conv1x1(y, w, dt):
        prec = 'highest' if np.dtype(dt) == np.dtype(np.float32) else None
        return jnp.einsum('oc,bchw->bohw', w.astype(dt), y.astype(dt),
                          precision=prec, preferred_element_type=jnp.float32)

    f = bn_relu(conv1x1(X, params['w1'], conv_dtype), params['g1'], params['b1'])
    rf = f.reshape(B, S, S)
    tf = jnp.swapaxes(rf, 1, 2).reshape(B, S, H, W)
    o = bn_relu(conv1x1(tf, params['w2'], conv_dtype), params['g2'], params['b2'])

    avg = jnp.mean(o, axis=(2, 3))                                   # (B, C)
    si = jnp.std(o.reshape(B, C, S), axis=2, ddof=1)                 # (B, C)
    aw = jnp.maximum(jnp.dot(avg, params['wa'].T, precision='highest') + params['ba'], 0.0)
    sw = jnp.maximum(jnp.dot(si, params['ws'].T, precision='highest') + params['bs'], 0.0)
    wgt = jax.nn.sigmoid(aw + sw)
    a = o * wgt[:, :, None, None]

    out = bn_relu(conv1x1(a, params['w3'], jnp.float32), params['g3'], params['b3'])
    c_out = out.reshape(B, out.shape[1], S)
    c = jnp.einsum('bis,bjs->bij', c_out, c_out, precision='highest')
    c1 = jax.nn.softmax(c, axis=1)
    c2 = jax.nn.softmax(c1, axis=2)
    del is_f32
    return out, c2


if __name__ == "__main__":
    # Small shapes consistent with the module: H = W = featuresize is required.
    B, ch_in1, ch_in2, ch_out, featuresize = 2, 2, 2, 8, 8
    C = ch_in1 + ch_in2
    H = W = featuresize
    F2 = featuresize * featuresize

    key = jax.random.PRNGKey(0)
    keys = jax.random.split(key, 9)
    params = {
        # conv weights stored as (out_channels, in_channels)  (1x1 kernels)
        'w1': jax.random.normal(keys[0], (F2, C), jnp.float32) * 0.2,
        'g1': jnp.ones((F2,), jnp.float32), 'b1': jnp.zeros((F2,), jnp.float32),
        'w2': jax.random.normal(keys[1], (C, F2), jnp.float32) * 0.2,
        'g2': jnp.ones((C,), jnp.float32), 'b2': jnp.zeros((C,), jnp.float32),
        'wa': jax.random.normal(keys[2], (C, C), jnp.float32) * 0.2,
        'ba': jax.random.normal(keys[3], (C,), jnp.float32) * 0.1,
        'ws': jax.random.normal(keys[4], (C, C), jnp.float32) * 0.2,
        'bs': jax.random.normal(keys[5], (C,), jnp.float32) * 0.1,
        'w3': jax.random.normal(keys[6], (ch_out, C), jnp.float32) * 0.2,
        'g3': jnp.ones((ch_out,), jnp.float32), 'b3': jnp.zeros((ch_out,), jnp.float32),
    }

    x11 = jax.random.normal(keys[7], (B, ch_in1, H, W), jnp.float32)
    x22 = jax.random.normal(keys[8], (B, ch_in2, H, W), jnp.float32)

    # Default path: auto dtype policy picks f32 matmuls at this toy contraction size,
    # so it is checked tightly against the f32 PyTorch-mirroring reference.
    out, c_norm = intrafusion_spectral(x11, x22, params)
    jax.block_until_ready((out, c_norm))
    out_ref, c_ref = reference(x11, x22, params)
    np.testing.assert_allclose(np.asarray(out), np.asarray(out_ref), rtol=2e-2, atol=2e-3)
    np.testing.assert_allclose(np.asarray(c_norm), np.asarray(c_ref), rtol=2e-2, atol=2e-3)

    # bf16-MXU path (what the auto policy selects at production featuresize >= 16),
    # validated against a reference that mirrors the same per-stage operand casts.
    out_bf, c_bf = intrafusion_spectral(x11, x22, params, conv_dtype=jnp.bfloat16)
    jax.block_until_ready((out_bf, c_bf))
    out_ref_bf, c_ref_bf = reference(x11, x22, params, conv_dtype=jnp.bfloat16)
    np.testing.assert_allclose(np.asarray(out_bf), np.asarray(out_ref_bf), rtol=2e-2, atol=2e-3)
    np.testing.assert_allclose(np.asarray(c_bf), np.asarray(c_ref_bf), rtol=2e-2, atol=2e-3)

    print("KERNEL_OK")
</pallas_src>

<mosaic_0001>
module attributes {stable_mosaic.version = 11 : i64} {
  func.func @intrafusion_stage1_kernel(%arg0: i32, %arg1: memref<2x64x4xf32, #tpu.memory_space<vmem>>, %arg2: memref<4x64xf32, #tpu.memory_space<vmem>>, %arg3: memref<1x64xf32, #tpu.memory_space<vmem>>, %arg4: memref<1x64xf32, #tpu.memory_space<vmem>>, %arg5: memref<4x64xf32, #tpu.memory_space<vmem>>, %arg6: memref<2x4x64xf32, #tpu.memory_space<vmem>>) attributes {dimension_semantics = [#tpu.dimension_semantics<parallel>], iteration_bounds = array<i64: 1>, scalar_prefetch = 0 : i64, scratch_operands = 0 : i64, tpu.core_type = #tpu.core_type<tc>, window_params = [{pipeline_mode = #tpu.pipeline_mode<synchronous>, transform_indices = @transform_0, window_bounds = array<i64: 2, 64, 4>}, {transform_indices = @transform_1, window_bounds = array<i64: 4, 64>}, {transform_indices = @transform_2, window_bounds = array<i64: 1, 64>}, {transform_indices = @transform_3, window_bounds = array<i64: 1, 64>}, {pipeline_mode = #tpu.pipeline_mode<synchronous>, transform_indices = @transform_4, window_bounds = array<i64: 4, 64>}, {transform_indices = @transform_5, window_bounds = array<i64: 2, 4, 64>}]} {
    %c0 = arith.constant 0 : index
    %c0_0 = arith.constant 0 : index
    %0 = vector.load %arg2[%c0, %c0_0] : memref<4x64xf32, #tpu.memory_space<vmem>>, vector<4x64xf32>
    %c0_1 = arith.constant 0 : index
    %c0_2 = arith.constant 0 : index
    %1 = vector.load %arg5[%c0_1, %c0_2] : memref<4x64xf32, #tpu.memory_space<vmem>>, vector<4x64xf32>
    %c0_3 = arith.constant 0 : index
    %c0_4 = arith.constant 0 : index
    %c0_5 = arith.constant 0 : index
    %2 = vector.load %arg1[%c0_3, %c0_4, %c0_5] : memref<2x64x4xf32, #tpu.memory_space<vmem>>, vector<1x64x4xf32>
    %3 = vector.shape_cast %2 : vector<1x64x4xf32> to vector<64x4xf32>
    %cst = arith.constant dense<0.000000e+00> : vector<64x64xf32>
    %4 = tpu.matmul %3, %0, %cst {dimension_numbers = #tpu.dot_dimension_numbers<[1], [0], [0], [1], [0, 0, 1, 1], [], []>} : vector<64x4xf32>, vector<4x64xf32>, vector<64x64xf32> -> vector<64x64xf32>
    %c1 = arith.constant 1 : index
    %c0_6 = arith.constant 0 : index
    %c0_7 = arith.constant 0 : index
    %5 = vector.load %arg1[%c1, %c0_6, %c0_7] : memref<2x64x4xf32, #tpu.memory_space<vmem>>, vector<1x64x4xf32>
    %6 = vector.shape_cast %5 : vector<1x64x4xf32> to vector<64x4xf32>
    %cst_8 = arith.constant dense<0.000000e+00> : vector<64x64xf32>
    %7 = tpu.matmul %6, %0, %cst_8 {dimension_numbers = #tpu.dot_dimension_numbers<[1], [0], [0], [1], [0, 0, 1, 1], [], []>} : vector<64x4xf32>, vector<4x64xf32>, vector<64x64xf32> -> vector<64x64xf32>
    %8 = arith.addf %4, %7 : vector<64x64xf32>
    %cst_9 = arith.constant dense<0.000000e+00> : vector<64xf32>
    %9 = vector.multi_reduction <add>, %8, %cst_9 [0] : vector<64x64xf32> to vector<64xf32>
    %10 = vector.shape_cast %9 : vector<64xf32> to vector<1x64xf32>
    %cst_10 = arith.constant 7.812500e-03 : f32
    %11 = vector.broadcast %cst_10 : f32 to vector<1x64xf32>
    %12 = arith.mulf %10, %11 : vector<1x64xf32>
    %13 = vector.broadcast %12 : vector<1x64xf32> to vector<64x64xf32>
    %14 = arith.subf %4, %13 : vector<64x64xf32>
    %15 = arith.mulf %14, %14 : vector<64x64xf32>
    %16 = vector.broadcast %12 : vector<1x64xf32> to vector<64x64xf32>
    %17 = arith.subf %7, %16 : vector<64x64xf32>
    %18 = arith.mulf %17, %17 : vector<64x64xf32>
    %19 = arith.addf %15, %18 : vector<64x64xf32>
    %cst_11 = arith.constant dense<0.000000e+00> : vector<64xf32>
    %20 = vector.multi_reduction <add>, %19, %cst_11 [0] : vector<64x64xf32> to vector<64xf32>
    %21 = vector.shape_cast %20 : vector<64xf32> to vector<1x64xf32>
    %cst_12 = arith.constant 7.812500e-03 : f32
    %22 = vector.broadcast %cst_12 : f32 to vector<1x64xf32>
    %23 = arith.mulf %21, %22 : vector<1x64xf32>
    %c0_13 = arith.constant 0 : index
    %c0_14 = arith.constant 0 : index
    %24 = vector.load %arg3[%c0_13, %c0_14] : memref<1x64xf32, #tpu.memory_space<vmem>>, vector<1x64xf32>
    %cst_15 = arith.constant 9.99999974E-6 : f32
    %25 = vector.broadcast %cst_15 : f32 to vector<1x64xf32>
    %26 = arith.addf %23, %25 : vector<1x64xf32>
    %27 = math.rsqrt %26 : vector<1x64xf32>
    %28 = arith.mulf %24, %27 : vector<1x64xf32>
    %c0_16 = arith.constant 0 : index
    %c0_17 = arith.constant 0 : index
    %29 = vector.load %arg4[%c0_16, %c0_17] : memref<1x64xf32, #tpu.memory_space<vmem>>, vector<1x64xf32>
    %30 = arith.mulf %12, %28 : vector<1x64xf32>
    %31 = arith.subf %29, %30 : vector<1x64xf32>
    %32 = vector.broadcast %28 : vector<1x64xf32> to vector<64x64xf32>
    %33 = arith.mulf %4, %32 : vector<64x64xf32>
    %34 = vector.broadcast %31 : vector<1x64xf32> to vector<64x64xf32>
    %35 = arith.addf %33, %34 : vector<64x64xf32>
    %cst_18 = arith.constant 0.000000e+00 : f32
    %36 = vector.broadcast %cst_18 : f32 to vector<64x64xf32>
    %37 = arith.maximumf %35, %36 : vector<64x64xf32>
    %cst_19 = arith.constant dense<0.000000e+00> : vector<4x64xf32>
    %38 = tpu.matmul %1, %37, %cst_19 {dimension_numbers = #tpu.dot_dimension_numbers<[1], [0], [0], [1], [0, 0, 1, 1], [], []>} : vector<4x64xf32>, vector<64x64xf32>, vector<4x64xf32> -> vector<4x64xf32>
    %c0_20 = arith.constant 0 : index
    %c0_21 = arith.constant 0 : index
    %c0_22 = arith.constant 0 : index
    %39 = vector.load %arg6[%c0_20, %c0_21, %c0_22] : memref<2x4x64xf32, #tpu.memory_space<vmem>>, vector<1x4x64xf32>
    %40 = vector.shape_cast %39 : vector<1x4x64xf32> to vector<4x64xf32>
    %41 = vector.shape_cast %38 : vector<4x64xf32> to vector<1x4x64xf32>
    tpu.vector_store %arg6[%c0_20, %c0_21, %c0_22], %41 {strides = array<i32>} : memref<2x4x64xf32, #tpu.memory_space<vmem>>, vector<1x4x64xf32>,
    %42 = vector.broadcast %28 : vector<1x64xf32> to vector<64x64xf32>
    %43 = arith.mulf %7, %42 : vector<64x64xf32>
    %44 = vector.broadcast %31 : vector<1x64xf32> to vector<64x64xf32>
    %45 = arith.addf %43, %44 : vector<64x64xf32>
    %cst_23 = arith.constant 0.000000e+00 : f32
    %46 = vector.broadcast %cst_23 : f32 to vector<64x64xf32>
    %47 = arith.maximumf %45, %46 : vector<64x64xf32>
    %cst_24 = arith.constant dense<0.000000e+00> : vector<4x64xf32>
    %48 = tpu.matmul %1, %47, %cst_24 {dimension_numbers = #tpu.dot_dimension_numbers<[1], [0], [0], [1], [0, 0, 1, 1], [], []>} : vector<4x64xf32>, vector<64x64xf32>, vector<4x64xf32> -> vector<4x64xf32>
    %c1_25 = arith.constant 1 : index
    %c0_26 = arith.constant 0 : index
    %c0_27 = arith.constant 0 : index
    %49 = vector.load %arg6[%c1_25, %c0_26, %c0_27] : memref<2x4x64xf32, #tpu.memory_space<vmem>>, vector<1x4x64xf32>
    %50 = vector.shape_cast %49 : vector<1x4x64xf32> to vector<4x64xf32>
    %51 = vector.shape_cast %48 : vector<4x64xf32> to vector<1x4x64xf32>
    tpu.vector_store %arg6[%c1_25, %c0_26, %c0_27], %51 {strides = array<i32>} : memref<2x4x64xf32, #tpu.memory_space<vmem>>, vector<1x4x64xf32>,
    return
  }
  func.func @transform_0(%arg0: i32) -> (i32, i32, i32) {
    %c0_i32 = arith.constant 0 : i32
    %c0_i32_0 = arith.constant 0 : i32
    %c0_i32_1 = arith.constant 0 : i32
    %c0_i32_2 = arith.constant 0 : i32
    return %c0_i32, %c0_i32_0, %c0_i32_1 : i32, i32, i32
  }
  func.func @transform_1(%arg0: i32) -> (i32, i32) {
    %c0_i32 = arith.constant 0 : i32
    %c0_i32_0 = arith.constant 0 : i32
    return %c0_i32, %arg0 : i32, i32
  }
  func.func @transform_2(%arg0: i32) -> (i32, i32) {
    %c0_i32 = arith.constant 0 : i32
    %c0_i32_0 = arith.constant 0 : i32
    return %c0_i32, %arg0 : i32, i32
  }
  func.func @transform_3(%arg0: i32) -> (i32, i32) {
    %c0_i32 = arith.constant 0 : i32
    %c0_i32_0 = arith.constant 0 : i32
    return %c0_i32, %arg0 : i32, i32
  }
  func.func @transform_4(%arg0: i32) -> (i32, i32) {
    %c0_i32 = arith.constant 0 : i32
    %c0_i32_0 = arith.constant 0 : i32
    %c0_i32_1 = arith.constant 0 : i32
    return %c0_i32, %c0_i32_0 : i32, i32
  }
  func.func @transform_5(%arg0: i32) -> (i32, i32, i32) {
    %c0_i32 = arith.constant 0 : i32
    %c0_i32_0 = arith.constant 0 : i32
    %c0_i32_1 = arith.constant 0 : i32
    return %c0_i32, %c0_i32_0, %arg0 : i32, i32, i32
  }
}

</mosaic_0001>

<bundles_post_ra>
// kernel: tpu_custom_call.1
= control target key start
LH: loop header
LB: loop body
LE: loop exit
PB: predicated region body
PF: predicated region fallthrough
CT: control target
= control target key end

     0   :  { %vm56_vm0 = vcmask 1043456   ;;  %vm31_vm1 = vcmask 31744   ;;  %s693_s0 = inlined_call_operand.vmem [shape: f32[2,64,4], index: 0, kind: input, shape index: {}]   ;;  %s694_s1 = inlined_call_operand.vmem [shape: f32[4,64], index: 1, kind: input, shape index: {}]   ;;  %s695_s2 = inlined_call_operand.vmem [shape: f32[1,64], index: 2, kind: input, shape index: {}]   ;;  %s696_s3 = inlined_call_operand.vmem [shape: f32[1,64], index: 3, kind: input, shape index: {}]   ;;  %s697_s4 = inlined_call_operand.vmem [shape: f32[4,64], index: 4, kind: input, shape index: {}]   ;;  %s698_s5 = inlined_call_operand.hbm [shape: f32[2,4,64], index: 5, kind: output, shape index: {}]  }
   0x1   :  { %v21_v0 = vld [vmem:[%s694_s1] sm:$0xf]  ;;  %v28_v3 = vld [vmem:[%s693_s0 + $0x28] sm:$0xff] }
   0x2   :  { %v23_v1 = vld [vmem:[%s693_s0] sm:$0xff]  ;;  %403 = vmatpush.msk.msra.mxu0 %vm56_vm0, %v21_v0  ;;  %420 = vmatpush.msk.msra.mxu1 %vm56_vm0, %v21_v0  ;;  %v417_v4 = vld [vmem:[%s693_s0 + $0x68] sm:$0xff] }
   0x3   :  { %v412_v2 = vld [vmem:[%s693_s0 + $0x40] sm:$0xff]  ;;  %404 = vmatmul.msk.f32.vlgmr.msra.gmra.mxu0 %vm31_vm1, %v23_v1  ;;  %431 = vmatpush.msk.msra.mxu2 %vm56_vm0, %v21_v0 }
   0x4   :  { %421 = vmatmul.msk.f32.vlgmr.msra.gmra.mxu1 %vm31_vm1, %v412_v2  ;;  %432 = vmatpush.msk.msra.mxu3 %vm56_vm0, %v21_v0 }
   0x5   :  { %409 = vmatmul.msk.f32.vlgmr.msra.gmra.mxu2 %vm31_vm1, %v28_v3  ;;  %426 = vmatmul.msk.f32.vlgmr.msra.gmra.mxu3 %vm31_vm1, %v417_v4 }
   0x6   :  { %10 = vsyncpa [#allocation3], 0  ;;  %v24_v5 = vld [vmem:[%s693_s0 + $0x8] sm:$0xff]  ;;  %v29_v7 = vld [vmem:[%s693_s0 + $0x30] sm:$0xff]  ;;  %vm183_vm2 = vcmask 523264   ;;  %s464_s28 = smov [#allocation2]  }
   0x7   :  { %v413_v6 = vld [vmem:[%s693_s0 + $0x48] sm:$0xff]  ;;  %v418_v8 = vld [vmem:[%s693_s0 + $0x70] sm:$0xff]  ;;  %v30_v11 = vld [vmem:[%s693_s0 + $0x38] sm:$0xff]  ;;  %s389_s29 = sshll.u32 %s464_s28, 4  ;;  %s391_s7 = sshll.u32 %s698_s5, 4  ;;  %vm337_vm6 = vcmask 519168   ;;  %s390_s29 = int_to_ptr.vmem [resolvable:$true] %s389_s29  ;;  %s392_s7 = int_to_ptr.hbm [resolvable:$true] %s391_s7 }
   0x8   :  { %v25_v9 = vld [vmem:[%s693_s0 + $0x10] sm:$0xff]  ;;  %v419_v12 = vld [vmem:[%s693_s0 + $0x78] sm:$0xff]  ;;  %v27_v15 = vld [vmem:[%s693_s0 + $0x20] sm:$0xff]  ;;  %s466_s8 = smov 4  }
   0x9   :  { %v414_v10 = vld [vmem:[%s693_s0 + $0x50] sm:$0xff]  ;;  %v26_v13 = vld [vmem:[%s693_s0 + $0x18] sm:$0xff]  ;;  %v416_v16 = vld [vmem:[%s693_s0 + $0x60] sm:$0xff] }
   0xa   :  { %v415_v14 = vld [vmem:[%s693_s0 + $0x58] sm:$0xff] }
   0xb   :  { %405 = vmatmul.msk.f32.gmra.mxu0 %vm31_vm1, %v24_v5 }
   0xc   :  { %422 = vmatmul.msk.f32.gmra.mxu1 %vm31_vm1, %v413_v6 }
   0xd   :  { %410 = vmatmul.msk.f32.gmra.mxu2 %vm31_vm1, %v29_v7  ;;  %427 = vmatmul.msk.f32.gmra.mxu3 %vm31_vm1, %v418_v8 }
  0x13   :  { %406 = vmatmul.msk.f32.gmra.mxu0 %vm31_vm1, %v25_v9 }
  0x14   :  { %423 = vmatmul.msk.f32.gmra.mxu1 %vm31_vm1, %v414_v10 }
  0x15   :  { %411 = vmatmul.msk.f32.gmra.mxu2 %vm31_vm1, %v30_v11  ;;  %428 = vmatmul.msk.f32.gmra.mxu3 %vm31_vm1, %v419_v12 }
  0x1b   :  { %407 = vmatmul.msk.f32.gmra.mxu0 %vm31_vm1, %v26_v13 }
  0x1c   :  { %424 = vmatmul.msk.f32.gmra.mxu1 %vm31_vm1, %v415_v14 }
  0x23   :  { %408 = vmatmul.msk.f32.gmra.mxu0 %vm31_vm1, %v27_v15 }
  0x24   :  { %425 = vmatmul.msk.f32.gmra.mxu1 %vm31_vm1, %v416_v16 }
  0x80   :  { %v564_v17 = vpop.f32.mrf.mxu0 }
  0x81   :  { %v566_v18 = vpop.f32.mrf.mxu1 }
  0x82   :  { %v175_v30 = vadd.f32 %v566_v18, %v564_v17 }
  0x84   :  { %v184_v34 = vsel %vm183_vm2, %v175_v30, 0.0 }
  0x88   :  { %v568_v19 = vpop.f32.mrf.mxu0  ;;  %v572_v21 = vpop.f32.mrf.mxu2 }
  0x89   :  { %v570_v20 = vpop.f32.mrf.mxu1  ;;  %v574_v22 = vpop.f32.mrf.mxu3 }
  0x8a   :  { %v176_v27 = vadd.f32 %v570_v20, %v568_v19  ;;  %v180_v43 = vadd.f32 %v574_v22, %v572_v21 }
  0x8c   :  { %v185_v32 = vsel %vm183_vm2, %v176_v27, 0.0  ;;  %v193_v50 = vsel %vm183_vm2, %v180_v43, 0.0 }
  0x8d   :  { %v186_v36 = vadd.f32 %v185_v32, %v184_v34 }
  0x90   :  { %v576_v23 = vpop.f32.mrf.mxu0  ;;  %v580_v25 = vpop.f32.mrf.mxu2 }
  0x91   :  { %v578_v24 = vpop.f32.mrf.mxu1  ;;  %v582_v26 = vpop.f32.mrf.mxu3 }
  0x92   :  { %v177_v31 = vadd.f32 %v578_v24, %v576_v23  ;;  %v181_v46 = vadd.f32 %v582_v26, %v580_v25 }
  0x94   :  { %v187_v35 = vsel %vm183_vm2, %v177_v31, 0.0  ;;  %v195_v52 = vsel %vm183_vm2, %v181_v46, 0.0 }
  0x95   :  { %v188_v40 = vadd.f32 %v187_v35, %v186_v36 }
  0x98   :  { %v586_v28 = vpop.f32.mrf.mxu0  ;;  %v600_v38 = vpop.f32.mrf.mxu2 }
  0x99   :  { %v588_v29 = vpop.f32.mrf.mxu1  ;;  %v602_v39 = vpop.f32.mrf.mxu3 }
  0x9a   :  { %v178_v33 = vadd.f32 %v588_v29, %v586_v28  ;;  %v182_v48 = vadd.f32 %v602_v39, %v600_v38 }
  0x9c   :  { %v189_v37 = vsel %vm183_vm2, %v178_v33, 0.0  ;;  %v197_v53 = vsel %vm183_vm2, %v182_v48, 0.0 }
  0x9d   :  { %v190_v45 = vadd.f32 %v189_v37, %v188_v40 }
  0xa0   :  { %v604_v41 = vpop.f32.mrf.mxu0 }
  0xa1   :  { %v606_v42 = vpop.f32.mrf.mxu1 }
  0xa2   :  { %v179_v44 = vadd.f32 %v606_v42, %v604_v41 }
  0xa4   :  { %v191_v47 = vsel %vm183_vm2, %v179_v44, 0.0 }
  0xa5   :  { %v192_v49 = vadd.f32 %v191_v47, %v190_v45 }
  0xa7   :  { %v194_v51 = vadd.f32 %v193_v50, %v192_v49 }
  0xa9   :  { %v196_v54 = vadd.f32 %v195_v52, %v194_v51 }
  0xab   :  { %v198_v55 = vadd.f32 %v197_v53, %v196_v54 }
  0xad   :  { %v199_v56 = vrot.slane %v198_v55, 4 }
  0xaf   :  { %v200_v57 = vadd.f32 %v199_v56, %v198_v55 }
  0xb1   :  { %v201_v58 = vrot.slane %v200_v57, 2 }
  0xb3   :  { %v202_v59 = vadd.f32 %v201_v58, %v200_v57 }
  0xb5   :  { %v203_v60 = vrot.slane %v202_v59, 1 }
  0xb7   :  { %v204_v61 = vadd.f32 %v203_v60, %v202_v59 }
  0xb9   :  { %v620_v62 = vmul.f32 0.0078125, %v204_v61 }
  0xbb   :  { %v206_v63 = vsub.f32 %v564_v17, %v620_v62  ;;  %v207_v0 = vsub.f32 %v568_v19, %v620_v62  ;;  %v208_v1 = vsub.f32 %v576_v23, %v620_v62  ;;  %v209_v2 = vsub.f32 %v586_v28, %v620_v62 }
  0xbc   :  { %v210_v3 = vsub.f32 %v604_v41, %v620_v62  ;;  %v222_v7 = vsub.f32 %v566_v18, %v620_v62  ;;  %v223_v8 = vsub.f32 %v570_v20, %v620_v62  ;;  %v224_v9 = vsub.f32 %v578_v24, %v620_v62 }
  0xbd   :  { %v214_v4 = vmul.f32 %v206_v63, %v206_v63  ;;  %v215_v5 = vmul.f32 %v207_v0, %v207_v0  ;;  %v216_v6 = vmul.f32 %v208_v1, %v208_v1  ;;  %v225_v10 = vsub.f32 %v588_v29, %v620_v62 }
  0xbe   :  { %v211_v11 = vsub.f32 %v572_v21, %v620_v62  ;;  %v217_v12 = vmul.f32 %v209_v2, %v209_v2  ;;  %v226_v13 = vsub.f32 %v606_v42, %v620_v62  ;;  %v227_v14 = vsub.f32 %v574_v22, %v620_v62 }
  0xbf   :  { %v230_v15 = vmul.f32 %v222_v7, %v222_v7  ;;  %v231_v16 = vmul.f32 %v223_v8, %v223_v8  ;;  %v232_v27 = vmul.f32 %v224_v9, %v224_v9  ;;  %v233_v30 = vmul.f32 %v225_v10, %v225_v10 }
  0xc0   :  { %v212_v31 = vsub.f32 %v580_v25, %v620_v62  ;;  %v218_v32 = vmul.f32 %v210_v3, %v210_v3  ;;  %v228_v33 = vsub.f32 %v582_v26, %v620_v62  ;;  %v234_v34 = vmul.f32 %v226_v13, %v226_v13 }
  0xc1   :  { %v238_v35 = vadd.f32 %v230_v15, %v214_v4  ;;  %v239_v36 = vadd.f32 %v231_v16, %v215_v5  ;;  %v240_v37 = vadd.f32 %v232_v27, %v216_v6  ;;  %v213_v40 = vsub.f32 %v600_v38, %v620_v62 }
  0xc2   :  { %v219_v43 = vmul.f32 %v211_v11, %v211_v11  ;;  %v229_v44 = vsub.f32 %v602_v39, %v620_v62  ;;  %v235_v45 = vmul.f32 %v227_v14, %v227_v14  ;;  %v241_v46 = vadd.f32 %v233_v30, %v217_v12 }
  0xc3   :  { %v246_v47 = vsel %vm183_vm2, %v238_v35, 0.0  ;;  %v247_v48 = vsel %vm183_vm2, %v239_v36, 0.0  ;;  %v220_v50 = vmul.f32 %v212_v31, %v212_v31  ;;  %v236_v51 = vmul.f32 %v228_v33, %v228_v33  ;;  %v281_v36 = vld [vmem:[%s696_s3] sm:$0x1] }
  0xc4   :  { %v248_v49 = vadd.f32 %v247_v48, %v246_v47  ;;  %v242_v52 = vadd.f32 %v234_v34, %v218_v32  ;;  %v249_v53 = vsel %vm183_vm2, %v240_v37, 0.0  ;;  %v221_v55 = vmul.f32 %v213_v40, %v213_v40  ;;  %v268_v32 = vld [vmem:[%s695_s2] sm:$0x1] }
  0xc5   :  { %v237_v56 = vmul.f32 %v229_v44, %v229_v44  ;;  %v243_v57 = vadd.f32 %v235_v45, %v219_v43  ;;  %v251_v58 = vsel %vm183_vm2, %v241_v46, 0.0  ;;  %v244_v60 = vadd.f32 %v236_v51, %v220_v50 }
  0xc6   :  { %v250_v54 = vadd.f32 %v249_v53, %v248_v49  ;;  %v253_v61 = vsel %vm183_vm2, %v242_v52, 0.0 }
  0xc7   :  { %v245_v0 = vadd.f32 %v237_v56, %v221_v55  ;;  %v255_v1 = vsel %vm183_vm2, %v243_v57, 0.0  ;;  %v257_v3 = vsel %vm183_vm2, %v244_v60, 0.0 }
  0xc8   :  { %v252_v59 = vadd.f32 %v251_v58, %v250_v54 }
  0xc9   :  { %v259_v5 = vsel %vm183_vm2, %v245_v0, 0.0 }
  0xca   :  { %v254_v63 = vadd.f32 %v253_v61, %v252_v59 }
  0xcc   :  { %v256_v2 = vadd.f32 %v255_v1, %v254_v63 }
  0xce   :  { %v258_v4 = vadd.f32 %v257_v3, %v256_v2 }
  0xd0   :  { %v260_v6 = vadd.f32 %v259_v5, %v258_v4 }
  0xd2   :  { %v261_v7 = vrot.slane %v260_v6, 4 }
  0xd4   :  { %v262_v8 = vadd.f32 %v261_v7, %v260_v6 }
  0xd6   :  { %v263_v9 = vrot.slane %v262_v8, 2 }
  0xd8   :  { %v264_v10 = vadd.f32 %v263_v9, %v262_v8 }
  0xda   :  { %v265_v11 = vrot.slane %v264_v10, 1 }
  0xdc   :  { %v266_v12 = vadd.f32 %v265_v11, %v264_v10 }
  0xde   :  { %v267_v13 = vmul.f32 0.0078125, %v266_v12 }
  0xe0   :  { %v269_v14 = vadd.f32 1e-05, %v267_v13 }
  0xe2   :  { %436 = vrsqrt.f32 %v269_v14  ;;  %vm276_vm4 = vweird.f32 %v269_v14 }
  0xe8   :  { %v437_v15 = vpop.eup %436 }
  0xe9   :  { %v271_v16 = vmul.f32 %v437_v15, %v269_v14  ;;  %vm277_vm3 = vweird.f32 %v437_v15 }
  0xea   :  { %vm278_vm5 = vmor %vm276_vm4, %vm277_vm3 }
  0xeb   :  { %v272_v27 = vmul.f32 %v437_v15, %v271_v16 }
  0xed   :  { %v273_v30 = vmul.f32 0.5, %v272_v27 }
  0xef   :  { %v274_v31 = vsub.f32 1.5, %v273_v30 }
  0xf1   :  { %v275_v33 = vmul.f32 %v437_v15, %v274_v31 }
  0xf3   :  { %v279_v34 = vsel %vm278_vm5, %v437_v15, %v275_v33 }
  0xf4   :  { %v280_v35 = vmul.f32 %v279_v34, %v268_v32 }
  0xf6   :  { %v282_v37 = vmul.f32 %v280_v35, %v620_v62  ;;  %v285_v40 = vperm.slane %v280_v35, 0 }
  0xf8   :  { %v283_v43 = vsub.f32 %v281_v36, %v282_v37  ;;  %v346_v44 = vmul.f32 %v285_v40, %v602_v39  ;;  %v294_v46 = vmul.f32 %v285_v40, %v600_v38  ;;  %v293_v47 = vmul.f32 %v285_v40, %v580_v25 }
  0xf9   :  { %v345_v48 = vmul.f32 %v285_v40, %v582_v26  ;;  %v292_v49 = vmul.f32 %v285_v40, %v572_v21  ;;  %v344_v50 = vmul.f32 %v285_v40, %v574_v22  ;;  %v291_v62 = vmul.f32 %v285_v40, %v604_v41 }
  0xfa   :  { %v296_v45 = vperm.slane %v283_v43, 0  ;;  %v343_v55 = vmul.f32 %v285_v40, %v606_v42  ;;  %v290_v25 = vmul.f32 %v285_v40, %v586_v28  ;;  %v342_v26 = vmul.f32 %v285_v40, %v588_v29 }
  0xfb   :  { %v289_v60 = vmul.f32 %v285_v40, %v576_v23  ;;  %v341_v41 = vmul.f32 %v285_v40, %v578_v24  ;;  %v288_v28 = vmul.f32 %v285_v40, %v568_v19  ;;  %v340_v29 = vmul.f32 %v285_v40, %v570_v20 }
  0xfc   :  { %v305_v51 = vadd.f32 %v296_v45, %v294_v46  ;;  %v354_v52 = vadd.f32 %v346_v44, %v296_v45  ;;  %v304_v53 = vadd.f32 %v296_v45, %v293_v47  ;;  %v353_v54 = vadd.f32 %v345_v48, %v296_v45 }
  0xfd   :  { %v303_v57 = vadd.f32 %v296_v45, %v292_v49  ;;  %v352_v38 = vadd.f32 %v344_v50, %v296_v45  ;;  %v302_v58 = vadd.f32 %v296_v45, %v291_v62  ;;  %v351_v59 = vadd.f32 %v343_v55, %v296_v45 }
  0xfe   :  { %v313_v39 = vmax.f32 %v305_v51, 0.0  ;;  %v362_v56 = vmax.f32 %v354_v52, 0.0  ;;  %v312_v21 = vmax.f32 %v304_v53, 0.0  ;;  %v361_v22 = vmax.f32 %v353_v54, 0.0 }
  0xff   :  { %v311_v42 = vmax.f32 %v303_v57, 0.0  ;;  %v360_v61 = vmax.f32 %v352_v38, 0.0  ;;  %v301_v63 = vadd.f32 %v296_v45, %v290_v25  ;;  %v350_v0 = vadd.f32 %v342_v26, %v296_v45 }
 0x100   :  { %325 = vmatpush.msrb.mxu2 %v313_v39  ;;  %371 = vmatpush.msrb.mxu3 %v362_v56  ;;  %v310_v1 = vmax.f32 %v302_v58, 0.0  ;;  %v359_v2 = vmax.f32 %v351_v59, 0.0  ;;  %v300_v3 = vadd.f32 %v296_v45, %v289_v60  ;;  %v349_v4 = vadd.f32 %v341_v41, %v296_v45 }
 0x101   :  { %v299_v5 = vadd.f32 %v296_v45, %v288_v28  ;;  %v348_v23 = vadd.f32 %v340_v29, %v296_v45  ;;  %v309_v24 = vmax.f32 %v301_v63, 0.0  ;;  %v358_v6 = vmax.f32 %v350_v0, 0.0 }
 0x102   :  { %326 = vmatpush.msrb.mxu2 %v312_v21  ;;  %372 = vmatpush.msrb.mxu3 %v361_v22  ;;  %v287_v7 = vmul.f32 %v285_v40, %v564_v17  ;;  %v339_v8 = vmul.f32 %v285_v40, %v566_v18  ;;  %v308_v19 = vmax.f32 %v300_v3, 0.0  ;;  %v357_v20 = vmax.f32 %v349_v4, 0.0  ;;  %v22_v17 = vld [vmem:[%s697_s4] sm:$0xf]  ;;  %s465_s4 = smov 64  }
 0x103   :  { %v307_v11 = vmax.f32 %v299_v5, 0.0  ;;  %v356_v12 = vmax.f32 %v348_v23, 0.0 }
 0x104   :  { %327 = vmatpush.msrb.mxu2 %v311_v42  ;;  %373 = vmatpush.msrb.mxu3 %v360_v61  ;;  %v298_v9 = vadd.f32 %v296_v45, %v287_v7  ;;  %v347_v10 = vadd.f32 %v339_v8, %v296_v45 }
 0x106   :  { %328 = vmatpush.msrb.mxu2 %v310_v1  ;;  %374 = vmatpush.msrb.mxu3 %v359_v2  ;;  %v306_v13 = vmax.f32 %v298_v9, 0.0  ;;  %v355_v14 = vmax.f32 %v347_v10, 0.0 }
 0x108   :  { %329 = vmatpush.msrb.mxu2 %v309_v24  ;;  %375 = vmatpush.msrb.mxu3 %v358_v6 }
 0x10a   :  { %330 = vmatpush.msrb.mxu2 %v308_v19  ;;  %376 = vmatpush.msrb.mxu3 %v357_v20 }
 0x10c   :  { %331 = vmatpush.msrb.mxu2 %v307_v11  ;;  %377 = vmatpush.msrb.mxu3 %v356_v12 }
 0x10e   :  { %332 = vmatpush.msrb.mxu2 %v306_v13  ;;  %378 = vmatpush.msrb.mxu3 %v355_v14 }
 0x10f   :  { %429 = vmatmul.msk.f32.vlgmr.msrb.gmra.mxu2 %vm183_vm2, %v22_v17  ;;  %430 = vmatmul.msk.f32.vlgmr.msrb.gmra.mxu3 %vm183_vm2, %v22_v17 }
 0x192   :  { %v334_v18 = vpop.f32.mrf.mxu2  ;;  %v380_v15 = vpop.f32.mrf.mxu3 }
 0x193   :  { %338 = vst.msk [vmem:[#allocation2] sm:$0xf] %vm337_vm6, %v334_v18 }
 0x194   :  { %384 = vst.msk [vmem:[#allocation2 + $0x4] sm:$0xf] %vm337_vm6, %v380_v15 }
 0x195   :  { %397 = dma.vmem_to_hbm [thread:$0]  %s390_s29, 128, %s392_s7, [#allocation3], %s465_s4, %s465_s4, %s466_s8  }
 0x196   :  { %462 = dma.done.wait [#allocation3], 128  }
 0x197   :  { %463 = vsyncadd [#allocation3], 4294967168 }
 0x198   :  { %402 = vsyncpa [#allocation3], 1 }

</bundles_post_ra>
